<compile_context>
chip_gen: v7x
topology: tpu7x:2x2x1
jax: 0.10.0
libtpu: 0.0.40
codegen_flags: <defaults>
</compile_context>

<pallas_src>
import math
import functools

import jax
import jax.numpy as jnp
import numpy as np
from jax.experimental import pallas as pl
from jax.experimental.pallas import tpu as pltpu

_SQRT2 = math.sqrt(2.0)


def _pick_tile(total, candidates):
    """Largest candidate dividing `total` that still yields >= 2 grid steps."""
    for t in candidates:
        if t < total and total % t == 0:
            return t
    return total


# ---------------------------------------------------------------------------
# Kernel 1: MinibatchStdLayer statistic.
#   x_ref: (N, H*W*C) f32, rows ordered n = g*M + m.   out: (M, 1) f32.
# ---------------------------------------------------------------------------
def _mbstd_kernel(x_ref, o_ref, *, G, M):
    x = x_ref[...]
    hwc = x.shape[1]
    inv_g = 1.0 / float(G)

    mu = jnp.zeros((M, hwc), jnp.float32)
    for g in range(G):
        mu = mu + x[g * M:(g + 1) * M, :]
    mu = mu * inv_g

    var = jnp.zeros_like(mu)
    for g in range(G):
        d = x[g * M:(g + 1) * M, :] - mu
        var = var + d * d
    var = var * inv_g

    sd = jnp.sqrt(var + 1e-8)
    # one collapsed reduction over (C, H, W)
    o_ref[...] = jnp.sum(sd, axis=1, keepdims=True) * (1.0 / float(hwc))


# ---------------------------------------------------------------------------
# Kernel 2: 3x3 conv (with the concatenated mbstd channel) as a single im2col
# GEMM per row tile, then bias + relu * sqrt(2).
# ---------------------------------------------------------------------------
def _conv_kernel(p_ref, w_ref, b_ref, o_ref):
    acc = jnp.dot(p_ref[...], w_ref[...], preferred_element_type=jnp.float32)
    o_ref[...] = (jnp.maximum(acc + b_ref[...], 0.0) * _SQRT2).astype(o_ref.dtype)


# ---------------------------------------------------------------------------
# Kernel 3: FullyConnectedLayer (relu), K-tiled with a resident f32 accumulator.
# ---------------------------------------------------------------------------
def _fc_kernel(h_ref, w_ref, b_ref, o_ref):
    k = pl.program_id(0)

    @pl.when(k == 0)
    def _():
        o_ref[...] = jnp.zeros_like(o_ref)

    o_ref[...] += jnp.dot(h_ref[...], w_ref[...],
                          preferred_element_type=jnp.float32)

    @pl.when(k == pl.num_programs(0) - 1)
    def _():
        o_ref[...] = jnp.maximum(o_ref[...] + b_ref[...], 0.0) * _SQRT2


def discriminator_epilogue(x_nchw, conv_w, conv_b, fc_w, fc_b, mbstd_group_size=4):
    x = x_nchw.astype(jnp.float32)
    N, C, H, W = x.shape
    Cin, Cout = C + 1, C
    G = min(mbstd_group_size, N)
    assert N % G == 0
    M = N // G
    HWC = H * W * C

    # ----- glue: channels-last layout -----
    x_nhwc = jnp.transpose(x, (0, 2, 3, 1))                     # (N,H,W,C)

    # ----- Pallas kernel 1: minibatch-std stat (tiny global reduction) -----
    stat = pl.pallas_call(
        functools.partial(_mbstd_kernel, G=G, M=M),
        grid=(1,),
        in_specs=[pl.BlockSpec((N, HWC), lambda i: (0, 0))],
        out_specs=pl.BlockSpec((M, 1), lambda i: (0, 0)),
        out_shape=jax.ShapeDtypeStruct((M, 1), jnp.float32),
        compiler_params=pltpu.CompilerParams(
            dimension_semantics=("arbitrary",)),
    )(x_nhwc.reshape(N, HWC))

    # ----- glue: concat std channel, zero-pad (implicit mask), im2col windows --
    stat_rows = jnp.tile(stat, (G, 1))                          # sample n -> stat[n % M]
    stat_ch = jnp.broadcast_to(stat_rows.reshape(N, 1, 1, 1), (N, H, W, 1))
    xcat = jnp.concatenate([x_nhwc, stat_ch], axis=-1)          # (N,H,W,C+1)
    xpad = jnp.pad(xcat, ((0, 0), (1, 1), (1, 1), (0, 0)))      # zero halo
    taps = [xpad[:, dy:dy + H, dx:dx + W, :]
            for dy in range(3) for dx in range(3)]
    Kc = 9 * Cin
    patches = jnp.concatenate(taps, axis=-1).reshape(N * H * W, Kc)
    patches = patches.astype(jnp.bfloat16)                      # bf16 MXU operands

    conv_wgain = 1.0 / np.sqrt(Cin * 9)
    w_eff = conv_w.astype(jnp.float32) * conv_wgain             # (Cout,Cin,3,3)
    w_im2col = jnp.transpose(w_eff, (2, 3, 1, 0)).reshape(Kc, Cout)
    w_im2col = w_im2col.astype(jnp.bfloat16)
    bconv = conv_b.astype(jnp.float32).reshape(1, Cout)

    # ----- Pallas kernel 2: fused im2col conv GEMM + bias + relu -----
    rows = N * H * W
    rt = _pick_tile(rows, (512, 256, 128, 64, 32, 16, 8))
    conv_out = pl.pallas_call(
        _conv_kernel,
        grid=(rows // rt,),
        in_specs=[
            pl.BlockSpec((rt, Kc), lambda i: (i, 0)),
            pl.BlockSpec((Kc, Cout), lambda i: (0, 0)),
            pl.BlockSpec((1, Cout), lambda i: (0, 0)),
        ],
        out_specs=pl.BlockSpec((rt, Cout), lambda i: (i, 0)),
        out_shape=jax.ShapeDtypeStruct((rows, Cout), jnp.bfloat16),
        compiler_params=pltpu.CompilerParams(
            dimension_semantics=("parallel",),
            vmem_limit_bytes=32 << 20),
    )(patches, w_im2col, bconv)

    # Free row-major reshape (rows already in (n,h,w) order, c on lanes);
    # the FC weight below is permuted so it consumes this (h,w,c) feature order,
    # eliminating the NCHW transpose + HBM round-trip of the old version.
    K = H * W * Cout
    hflat = conv_out.reshape(N, K)

    lr_mult = 0.01
    wfc_eff = fc_w.astype(jnp.float32) * (lr_mult / np.sqrt(K))   # (C, K), feat=(c,h,w)
    wfc_perm = jnp.transpose(wfc_eff.reshape(C, Cout, H * W), (2, 1, 0))
    wfc_perm = wfc_perm.reshape(K, C).astype(jnp.bfloat16)        # rows ordered (h,w,c)
    bfc = (fc_b.astype(jnp.float32) * lr_mult).reshape(1, C)

    # ----- Pallas kernel 3: FC GEMM, K-tiled with resident accumulator -----
    kt = _pick_tile(K, (2048, 1024, 512, 256, 128))
    out = pl.pallas_call(
        _fc_kernel,
        grid=(K // kt,),
        in_specs=[
            pl.BlockSpec((N, kt), lambda k: (0, k)),
            pl.BlockSpec((kt, C), lambda k: (k, 0)),
            pl.BlockSpec((1, C), lambda k: (0, 0)),
        ],
        out_specs=pl.BlockSpec((N, C), lambda k: (0, 0)),
        out_shape=jax.ShapeDtypeStruct((N, C), jnp.float32),
        compiler_params=pltpu.CompilerParams(
            dimension_semantics=("arbitrary",),
            vmem_limit_bytes=32 << 20),
    )(hflat, wfc_perm, bfc)
    return out


def _reference(x_nchw, conv_w, conv_b, fc_w, fc_b, mbstd_group_size=4):
    """Plain-JAX reference mirroring the PyTorch module."""
    x = x_nchw.astype(jnp.float32)
    N, C, H, W = x.shape
    G = min(mbstd_group_size, N)
    M = N // G
    y = x.reshape(G, M, 1, C, H, W)
    y = y - jnp.mean(y, axis=0)
    y = jnp.mean(y * y, axis=0)
    y = jnp.sqrt(y + 1e-8)
    y = jnp.mean(y, axis=(2, 3, 4))                # (M, 1)
    y = jnp.tile(y.reshape(M, 1, 1, 1), (G, 1, H, W))
    xc = jnp.concatenate([x, y], axis=1)
    wg = 1.0 / np.sqrt((C + 1) * 9)
    z = jax.lax.conv_general_dilated(
        xc, conv_w.astype(jnp.float32) * wg, (1, 1), ((1, 1), (1, 1)),
        dimension_numbers=("NCHW", "OIHW", "NCHW"),
        precision=jax.lax.Precision.HIGHEST)
    z = jnp.maximum(z + conv_b.reshape(1, -1, 1, 1), 0.0) * math.sqrt(2.0)
    zf = z.reshape(N, -1)
    lr_mult = 0.01
    wfc = fc_w.astype(jnp.float32) * (lr_mult / np.sqrt(C * H * W))
    o = zf @ wfc.T + (fc_b.astype(jnp.float32) * lr_mult).reshape(1, -1)
    return jnp.maximum(o, 0.0) * math.sqrt(2.0)


if __name__ == "__main__":
    key = jax.random.PRNGKey(0)
    k_x, k_cw, k_fw = jax.random.split(key, 3)

    N, C, R = 2, 4, 16          # batch, in_channels, resolution
    x = jax.random.normal(k_x, (N, C, R, R), jnp.float32)

    # Deterministic parameter init matching the PyTorch __init__ shapes:
    conv_w = jax.random.normal(k_cw, (C, C + 1, 3, 3), jnp.float32)      # randn
    conv_b = jnp.zeros((C,), jnp.float32)                                # zeros
    fc_w = jax.random.normal(k_fw, (C, C * R * R), jnp.float32) / 0.01   # randn / lr_mult
    fc_b = jnp.zeros((C,), jnp.float32)                                  # bias_init=0

    out = discriminator_epilogue(x, conv_w, conv_b, fc_w, fc_b, mbstd_group_size=4)
    out = jax.block_until_ready(out)

    ref = jax.block_until_ready(_reference(x, conv_w, conv_b, fc_w, fc_b, 4))
    assert out.shape == (N, C)
    assert bool(jnp.all(jnp.isfinite(out)))
    np.testing.assert_allclose(np.asarray(out), np.asarray(ref), rtol=5e-2, atol=5e-2)
    print("KERNEL_OK")
</pallas_src>

<mosaic_0001>
module attributes {stable_mosaic.version = 11 : i64} {
  func.func @_mbstd_kernel(%arg0: i32, %arg1: memref<2x1024xf32, #tpu.memory_space<vmem>>, %arg2: memref<1x1xf32, #tpu.memory_space<vmem>>) attributes {dimension_semantics = [#tpu.dimension_semantics<arbitrary>], iteration_bounds = array<i64: 1>, scalar_prefetch = 0 : i64, scratch_operands = 0 : i64, tpu.core_type = #tpu.core_type<tc>, window_params = [{pipeline_mode = #tpu.pipeline_mode<synchronous>, transform_indices = @transform_0, window_bounds = array<i64: 2, 1024>}, {pipeline_mode = #tpu.pipeline_mode<synchronous>, transform_indices = @transform_1, window_bounds = array<i64: 1, 1>}]} {
    %c0 = arith.constant 0 : index
    %c0_0 = arith.constant 0 : index
    %0 = vector.load %arg1[%c0, %c0_0] : memref<2x1024xf32, #tpu.memory_space<vmem>>, vector<2x1024xf32>
    %cst = arith.constant 0.000000e+00 : f32
    %1 = vector.broadcast %cst : f32 to vector<1x1024xf32>
    %2 = vector.extract_strided_slice %0 {offsets = [0, 0], sizes = [1, 1024], strides = [1, 1]} : vector<2x1024xf32> to vector<1x1024xf32>
    %3 = arith.addf %1, %2 : vector<1x1024xf32>
    %4 = vector.extract_strided_slice %0 {offsets = [1, 0], sizes = [1, 1024], strides = [1, 1]} : vector<2x1024xf32> to vector<1x1024xf32>
    %5 = arith.addf %3, %4 : vector<1x1024xf32>
    %cst_1 = arith.constant 5.000000e-01 : f32
    %6 = vector.broadcast %cst_1 : f32 to vector<1x1024xf32>
    %7 = arith.mulf %5, %6 : vector<1x1024xf32>
    %cst_2 = arith.constant 0.000000e+00 : f32
    %8 = vector.broadcast %cst_2 : f32 to vector<1x1024xf32>
    %9 = vector.extract_strided_slice %0 {offsets = [0, 0], sizes = [1, 1024], strides = [1, 1]} : vector<2x1024xf32> to vector<1x1024xf32>
    %10 = arith.subf %9, %7 : vector<1x1024xf32>
    %11 = arith.mulf %10, %10 : vector<1x1024xf32>
    %12 = arith.addf %8, %11 : vector<1x1024xf32>
    %13 = vector.extract_strided_slice %0 {offsets = [1, 0], sizes = [1, 1024], strides = [1, 1]} : vector<2x1024xf32> to vector<1x1024xf32>
    %14 = arith.subf %13, %7 : vector<1x1024xf32>
    %15 = arith.mulf %14, %14 : vector<1x1024xf32>
    %16 = arith.addf %12, %15 : vector<1x1024xf32>
    %cst_3 = arith.constant 5.000000e-01 : f32
    %17 = vector.broadcast %cst_3 : f32 to vector<1x1024xf32>
    %18 = arith.mulf %16, %17 : vector<1x1024xf32>
    %cst_4 = arith.constant 9.99999993E-9 : f32
    %19 = vector.broadcast %cst_4 : f32 to vector<1x1024xf32>
    %20 = arith.addf %18, %19 : vector<1x1024xf32>
    %21 = math.sqrt %20 : vector<1x1024xf32>
    %cst_5 = arith.constant dense<0.000000e+00> : vector<1xf32>
    %22 = vector.multi_reduction <add>, %21, %cst_5 [1] : vector<1x1024xf32> to vector<1xf32>
    %23 = vector.shape_cast %22 : vector<1xf32> to vector<1x1xf32>
    %cst_6 = arith.constant 9.765625E-4 : f32
    %24 = vector.broadcast %cst_6 : f32 to vector<1x1xf32>
    %25 = arith.mulf %23, %24 : vector<1x1xf32>
    %c0_7 = arith.constant 0 : index
    %c0_8 = arith.constant 0 : index
    %26 = vector.load %arg2[%c0_7, %c0_8] : memref<1x1xf32, #tpu.memory_space<vmem>>, vector<1x1xf32>
    tpu.vector_store %arg2[%c0_7, %c0_8], %25 {strides = array<i32>} : memref<1x1xf32, #tpu.memory_space<vmem>>, vector<1x1xf32>,
    return
  }
  func.func @transform_0(%arg0: i32) -> (i32, i32) {
    %c0_i32 = arith.constant 0 : i32
    %c0_i32_0 = arith.constant 0 : i32
    %c0_i32_1 = arith.constant 0 : i32
    return %c0_i32, %c0_i32_0 : i32, i32
  }
  func.func @transform_1(%arg0: i32) -> (i32, i32) {
    %c0_i32 = arith.constant 0 : i32
    %c0_i32_0 = arith.constant 0 : i32
    %c0_i32_1 = arith.constant 0 : i32
    return %c0_i32, %c0_i32_0 : i32, i32
  }
}

</mosaic_0001>

<bundles_post_ra>
// kernel: tpu_custom_call.1
= control target key start
LH: loop header
LB: loop body
LE: loop exit
PB: predicated region body
PF: predicated region fallthrough
CT: control target
= control target key end

     0   :  { %6 = vsyncpa [#allocation3], 0  ;;  %s261_s0 = inlined_call_operand.hbm [shape: f32[2,1024], index: 0, kind: input, shape index: {}]   ;;  %s262_s1 = inlined_call_operand.hbm [shape: f32[1,1], index: 1, kind: output, shape index: {}]  }
   0x1   :  { %7 = vsyncpa [#allocation4], 0  ;;  %s217_s6 = smov [#allocation2]   ;;  %s169_s10 = scalar_lea.hbm %s261_s0, 256 }
   0x2   :  { %s14_s7 = sshll.u32 %s217_s6, 4  ;;  %p170_p0 = scmp.ne.s32.totalorder %s261_s0, %s169_s10  ;;  %s15_s7 = int_to_ptr.vmem [resolvable:$true] %s14_s7 }
   0x3   :  { %p173_p1 = scmp.lt.u32.totalorder %s169_s10, %s261_s0 }
   0x5   :  { %p175_p2 = pnand %p173_p1, %p170_p0 }
   0x7   :  { %178 = shalt.err (!%p175_p2)
}
   0x8   :  { %s179_s15 = scalar_lea.vmem %s15_s7, 256  ;;  %p184_p4 = scmp.lt.s32.totalorder %s15_s7, %s15_s7 }
   0x9   :  { %p180_p3 = scmp.ne.s32.totalorder %s15_s7, %s179_s15  ;;  %p185_p5 = scmp.lt.s32.totalorder %s179_s15, %s179_s15 }
   0xb   :  { %p186_p6 = por %p185_p5, %p184_p4 }
   0xd   :  { %p187_p7 = pnand %p186_p6, %p180_p3 }
   0xf   :  { %190 = shalt.err (!%p187_p7)
}
  0x10   :  { %17 = dma.hbm_to_vmem [thread:$0]  %s261_s0, 256, %s15_s7, [#allocation3]  }
  0x11   :  { %213 = dma.done.wait [#allocation3], 256  }
  0x12   :  { %214 = vsyncadd [#allocation3], 4294967040  ;;  %v21_v0 = vld [vmem:[#allocation2] sm:$0xff]  ;;  %v22_v1 = vld [vmem:[#allocation2 + $0x8] sm:$0xff]  ;;  %v83_v26 = vlaneseq  ;;  %vm123_vm4 = vcmask 1040384   ;;  %s218_s0 = smov [#allocation5]  }
  0x13   :  { %v159_v2 = vrot.slane %v21_v0, 9  ;;  %v160_v3 = vrot.slane %v22_v1, 9  ;;  %s150_s18 = sshll.u32 %s218_s0, 4  ;;  %vm142_vm5 = vcmask 0   ;;  %s151_s18 = int_to_ptr.vmem [resolvable:$true] %s150_s18 }
  0x14   :  { %v84_v27 = vshrl.u32 %v83_v26, 7  ;;  %s191_s19 = scalar_lea.vmem %s151_s18, 16  ;;  %s195_s20 = scalar_lea.vmem %s151_s18, 32 }
  0x15   :  { %v33_v4 = vadd.f32 %v159_v2, %v21_v0  ;;  %v34_v5 = vadd.f32 %v160_v3, %v22_v1  ;;  %p192_p8 = scmp.ne.s32.totalorder %s151_s18, %s191_s19  ;;  %p196_p9 = scmp.lt.s32.totalorder %s151_s18, %s151_s18 }
  0x16   :  { %v85_v28 = vsub.s32 0, %v84_v27  ;;  %v89_v31 = vsub.s32 2, %v84_v27  ;;  %v93_v32 = vsub.s32 4, %v84_v27  ;;  %v97_v37 = vsub.s32 6, %v84_v27  ;;  %p197_p10 = scmp.lt.s32.totalorder %s195_s20, %s191_s19 }
  0x17   :  { %v35_v6 = vmul.f32 0.5, %v33_v4  ;;  %v36_v7 = vmul.f32 0.5, %v34_v5 }
  0x18   :  { %p198_p11 = por %p197_p10, %p196_p9 }
  0x19   :  { %v37_v8 = vsub.f32 %v21_v0, %v35_v6  ;;  %v45_v9 = vrot.slane %v35_v6, 7  ;;  %v38_v10 = vsub.f32 %v22_v1, %v36_v7  ;;  %v46_v11 = vrot.slane %v36_v7, 7 }
  0x1a   :  { %p199_p12 = pnand %p198_p11, %p192_p8 }
  0x1b   :  { %v49_v12 = vsub.f32 %v21_v0, %v45_v9  ;;  %v50_v13 = vsub.f32 %v22_v1, %v46_v11  ;;  %v39_v14 = vmul.f32 %v37_v8, %v37_v8  ;;  %v40_v16 = vmul.f32 %v38_v10, %v38_v10 }
  0x1d   :  { %v51_v15 = vmul.f32 %v49_v12, %v49_v12  ;;  %v52_v17 = vmul.f32 %v50_v13, %v50_v13 }
  0x1f   :  { %v161_v18 = vrot.slane %v51_v15, 9  ;;  %v162_v19 = vrot.slane %v52_v17, 9 }
  0x21   :  { %v61_v20 = vadd.f32 %v161_v18, %v39_v14  ;;  %v62_v21 = vadd.f32 %v162_v19, %v40_v16 }
  0x23   :  { %v63_v22 = vmul.f32 0.5, %v61_v20  ;;  %v64_v23 = vmul.f32 0.5, %v62_v21 }
  0x25   :  { %v65_v24 = vadd.f32 1e-08, %v63_v22  ;;  %v66_v25 = vadd.f32 1e-08, %v64_v23 }
  0x27   :  { %165 = vrsqrt.f32 %v65_v24  ;;  %vm69_vm0 = vcmp.eq.f32.partialorder %v65_v24, inf  ;;  %v72_v30 = vand.u32 2147483648, %v65_v24  ;;  %vm71_vm1 = vcmp.eq.f32.partialorder %v65_v24, 0.0 }
  0x28   :  { %167 = vrsqrt.f32 %v66_v25  ;;  %vm76_vm2 = vcmp.eq.f32.partialorder %v66_v25, inf  ;;  %v79_v35 = vand.u32 2147483648, %v66_v25  ;;  %vm78_vm3 = vcmp.eq.f32.partialorder %v66_v25, 0.0 }
  0x31   :  { %v166_v29 = vpop.eup %165 }
  0x32   :  { %v168_v33 = vpop.eup %167  ;;  %v68_v34 = vmul.f32 %v166_v29, %v65_v24 }
  0x33   :  { %v75_v36 = vmul.f32 %v168_v33, %v66_v25 }
  0x34   :  { %v70_v38 = vsel %vm69_vm0, %v65_v24, %v68_v34 }
  0x35   :  { %v73_v39 = vsel %vm71_vm1, %v72_v30, %v70_v38  ;;  %v77_v40 = vsel %vm76_vm2, %v66_v25, %v75_v36 }
  0x36   :  { %v80_v41 = vsel %vm78_vm3, %v79_v35, %v77_v40  ;;  %v86_v42 = vrot.slane %v73_v39, %v85_v28  ;;  %v90_v43 = vrot.slane %v73_v39, %v89_v31  ;;  %v94_v44 = vrot.slane %v73_v39, %v93_v32 }
  0x37   :  { %v98_v45 = vrot.slane %v73_v39, %v97_v37  ;;  %v102_v46 = vrot.slane %v80_v41, %v85_v28  ;;  %v106_v51 = vrot.slane %v80_v41, %v89_v31  ;;  %v110_v54 = vrot.slane %v80_v41, %v93_v32 }
  0x38   :  { %v124_v47 = vsel %vm123_vm4, %v86_v42, 0.0  ;;  %v125_v48 = vsel %vm123_vm4, %v90_v43, 0.0  ;;  %v127_v49 = vsel %vm123_vm4, %v94_v44, 0.0  ;;  %v114_v57 = vrot.slane %v80_v41, %v97_v37 }
  0x39   :  { %v126_v50 = vadd.f32 %v125_v48, %v124_v47  ;;  %v129_v52 = vsel %vm123_vm4, %v98_v45, 0.0  ;;  %v131_v55 = vsel %vm123_vm4, %v102_v46, 0.0  ;;  %v133_v58 = vsel %vm123_vm4, %v106_v51, 0.0 }
  0x3a   :  { %v135_v60 = vsel %vm123_vm4, %v110_v54, 0.0  ;;  %v137_v62 = vsel %vm123_vm4, %v114_v57, 0.0 }
  0x3b   :  { %v128_v53 = vadd.f32 %v127_v49, %v126_v50 }
  0x3d   :  { %v130_v56 = vadd.f32 %v129_v52, %v128_v53 }
  0x3f   :  { %v132_v59 = vadd.f32 %v131_v55, %v130_v56 }
  0x41   :  { %v134_v61 = vadd.f32 %v133_v58, %v132_v59 }
  0x43   :  { %v136_v63 = vadd.f32 %v135_v60, %v134_v61 }
  0x45   :  { %v138_v0 = vadd.f32 %v137_v62, %v136_v63 }
  0x47   :  { %139 = vadd.xlane.f32.xlu0 %v138_v0 }
  0xd4   :  { %v140_v1 = vpop.xlane.xlu0 %139 }
  0xd5   :  { %v141_v2 = vmul.f32 0.0009765625, %v140_v1 }
  0xd7   :  { %143 = vst.msk [vmem:[#allocation5] sm:$0x1] %vm142_vm5, %v141_v2 }
  0xd8   :  { %202 = shalt.err (!%p199_p12)
}
  0xd9   :  { %s203_s23 = scalar_lea.hbm %s262_s1, 16 }
  0xda   :  { %p204_p13 = scmp.ne.s32.totalorder %s262_s1, %s203_s23  ;;  %p207_p0 = scmp.lt.u32.totalorder %s203_s23, %s262_s1 }
  0xdc   :  { %p209_p1 = pnand %p207_p0, %p204_p13 }
  0xde   :  { %212 = shalt.err (!%p209_p1)
}
  0xdf   :  { %153 = dma.vmem_to_hbm [thread:$0]  %s151_s18, 16, %s262_s1, [#allocation4]  }
  0xe0   :  { %215 = dma.done.wait [#allocation4], 16  }
  0xe1   :  { %216 = vsyncadd [#allocation4], 4294967280 }
  0xe2   :  { %157 = vsyncpa [#allocation3], 1 }
  0xe3   :  { %158 = vsyncpa [#allocation4], 1 }

</bundles_post_ra>
